<compile_context>
chip_gen: v5e
topology: v5e:2x2
jax: 0.10.0
libtpu: 0.0.40
codegen_flags: <defaults>
</compile_context>

<pallas_src>
import functools

import jax
import jax.numpy as jnp
from jax.experimental import pallas as pl
from jax.experimental.pallas import tpu as pltpu


# ------------------------------ helpers ------------------------------------


def _round_up(x, m):
    return (x + m - 1) // m * m


def _sublane_multiple(dtype):
    # f32 vregs pack (8,128), bf16 (16,128), int8/fp8 (32,128).
    return 8 * (4 // jnp.dtype(dtype).itemsize)


def _vmem_usable_bytes():
    try:
        cap = int(pltpu.get_tpu_info().vmem_capacity_bytes)
    except Exception:
        cap = 64 << 20  # conservative default: v7x per-TensorCore VMEM
    return int(cap * 0.85)


def _divisor_tile(dim):
    # dim is a multiple of 128; largest MXU-friendly tile that divides it.
    for t in (512, 256, 128):
        if dim % t == 0:
            return t
    return 128


# ------------------------- fused 3-layer kernel -----------------------------


def _densenet_kernel(x_ref, w1_ref, b1_ref, w2_ref, b2_ref, w3_ref, b3_ref, o_ref):
    wdt = w1_ref.dtype
    # fc1 + relu (f32 accumulation on the MXU)
    h1 = jnp.dot(x_ref[...], w1_ref[...], preferred_element_type=jnp.float32)
    h1 = jnp.maximum(h1 + b1_ref[...].astype(jnp.float32), 0.0)
    # fc2 + relu
    h2 = jnp.dot(h1.astype(wdt), w2_ref[...], preferred_element_type=jnp.float32)
    h2 = jnp.maximum(h2 + b2_ref[...].astype(jnp.float32), 0.0)
    # fc3 (no activation)
    out = jnp.dot(h2.astype(wdt), w3_ref[...], preferred_element_type=jnp.float32)
    o_ref[...] = (out + b3_ref[...].astype(jnp.float32)).astype(o_ref.dtype)


def _fused_forward(x_p, pp, *, tb, vmem_usable):
    F_pad, H_pad, O_pad = pp["F_pad"], pp["H_pad"], pp["O_pad"]
    wdtype = pp["dtype"]
    itemsize = jnp.dtype(wdtype).itemsize
    B_pad = x_p.shape[0]
    n_tiles = B_pad // tb

    weight_elems = (F_pad * H_pad + H_pad * H_pad + H_pad * O_pad
                    + 2 * H_pad + O_pad)
    # Megacore only pays off with enough grid steps; otherwise it just
    # replicates the resident weights into both TensorCores' VMEM (v7x).
    semantics = ("parallel",) if n_tiles >= 4 else ("arbitrary",)

    def build_and_call(single_buffer_weights):
        if single_buffer_weights:
            resident_kwargs = dict(pipeline_mode=pl.Buffered(1))
            w_bufs = 1
        else:
            resident_kwargs = {}
            w_bufs = 2

        def resident(shape):
            # Constant index_map -> same block every step -> weights stay
            # VMEM-resident (DMA'd once, not per batch tile).
            return pl.BlockSpec(shape, lambda i: (0, 0), **resident_kwargs)

        in_specs = [
            pl.BlockSpec((tb, F_pad), lambda i: (i, 0)),  # x: batch-tiled, pipelined
            resident((F_pad, H_pad)), resident((1, H_pad)),
            resident((H_pad, H_pad)), resident((1, H_pad)),
            resident((H_pad, O_pad)), resident((1, O_pad)),
        ]
        out_specs = pl.BlockSpec((tb, O_pad), lambda i: (i, 0))

        footprint = (w_bufs * weight_elems * itemsize
                     + 2 * tb * F_pad * itemsize   # double-buffered x tiles
                     + 2 * tb * O_pad * 4          # double-buffered o tiles (f32)
                     + 2 * tb * H_pad * 4)         # h1/h2 f32 intermediates
        vmem_limit = min(vmem_usable, footprint + max(footprint // 4, 4 << 20))
        vmem_limit = max(vmem_limit, footprint)    # never clamp below footprint

        return pl.pallas_call(
            _densenet_kernel,
            grid=(n_tiles,),
            out_shape=jax.ShapeDtypeStruct((B_pad, O_pad), jnp.float32),
            in_specs=in_specs,
            out_specs=out_specs,
            compiler_params=pltpu.CompilerParams(
                dimension_semantics=semantics,
                vmem_limit_bytes=vmem_limit,
            ),
        )(x_p, pp["w1"], pp["b1"], pp["w2"], pp["b2"], pp["w3"], pp["b3"])

    try:
        return build_and_call(True)
    except Exception:
        # Older jax without pipeline_mode / pl.Buffered support.
        return build_and_call(False)


# ------------------- K/N-tiled per-layer fallback path ----------------------


def _linear_kernel(x_ref, w_ref, b_ref, o_ref, acc_ref, *, activate):
    k = pl.program_id(2)

    @pl.when(k == 0)
    def _():
        acc_ref[...] = jnp.zeros_like(acc_ref)

    acc_ref[...] += jnp.dot(x_ref[...], w_ref[...],
                            preferred_element_type=jnp.float32)

    @pl.when(k == pl.num_programs(2) - 1)
    def _():
        out = acc_ref[...] + b_ref[...].astype(jnp.float32)
        if activate:
            out = jnp.maximum(out, 0.0)
        o_ref[...] = out.astype(o_ref.dtype)


def _tiled_linear(x_p, w_p, b_p, *, out_dtype, activate, tb, vmem_usable):
    Bp, Kp = x_p.shape
    Np = w_p.shape[1]
    tk = _divisor_tile(Kp)
    tn = _divisor_tile(Np)
    grid = (Bp // tb, Np // tn, Kp // tk)

    in_item = jnp.dtype(x_p.dtype).itemsize
    w_item = jnp.dtype(w_p.dtype).itemsize
    out_item = jnp.dtype(out_dtype).itemsize
    need = (2 * (tb * tk * in_item + tk * tn * w_item + tn * w_item)
            + 2 * tb * tn * out_item + tb * tn * 4)
    vmem_limit = min(vmem_usable, need + max(need // 2, 4 << 20))

    n_parallel = grid[0] * grid[1]
    semantics = (("parallel", "parallel", "arbitrary") if n_parallel >= 4
                 else ("arbitrary", "arbitrary", "arbitrary"))

    return pl.pallas_call(
        functools.partial(_linear_kernel, activate=activate),
        grid=grid,
        out_shape=jax.ShapeDtypeStruct((Bp, Np), out_dtype),
        in_specs=[
            pl.BlockSpec((tb, tk), lambda i, j, k: (i, k)),
            pl.BlockSpec((tk, tn), lambda i, j, k: (k, j)),
            pl.BlockSpec((1, tn), lambda i, j, k: (0, j)),
        ],
        out_specs=pl.BlockSpec((tb, tn), lambda i, j, k: (i, j)),
        scratch_shapes=[pltpu.VMEM((tb, tn), jnp.float32)],
        compiler_params=pltpu.CompilerParams(
            dimension_semantics=semantics,
            vmem_limit_bytes=vmem_limit,
        ),
    )(x_p, w_p, b_p)


# --------------------------- public wrapper ---------------------------------


def prepare_params(params):
    """Pad params to hardware tiles ONCE (call at init / checkpoint load).

    Weights are [in_dim, out_dim] (transposed vs PyTorch); biases are [1, out].
    """
    w1, b1, w2, b2, w3, b3 = params
    wdtype = w1.dtype
    F, H = w1.shape
    out_dim = w3.shape[1]
    F_pad = _round_up(F, 128)
    H_pad = _round_up(H, 128)
    O_pad = _round_up(out_dim, 128)

    def pad2(a, rows, cols):
        buf = jnp.zeros((rows, cols), wdtype)
        return buf.at[:a.shape[0], :a.shape[1]].set(a.astype(wdtype))

    return {
        "w1": pad2(w1, F_pad, H_pad), "b1": pad2(b1.reshape(1, -1), 1, H_pad),
        "w2": pad2(w2, H_pad, H_pad), "b2": pad2(b2.reshape(1, -1), 1, H_pad),
        "w3": pad2(w3, H_pad, O_pad), "b3": pad2(b3.reshape(1, -1), 1, O_pad),
        "F": F, "H": H, "out_dim": out_dim,
        "F_pad": F_pad, "H_pad": H_pad, "O_pad": O_pad,
        "dtype": wdtype,
    }


def densenet_forward(x, prepared, *, batch_tile=256, force_tiled=False):
    """Fused 3-layer MLP forward over pre-padded params (prepare_params()).

    Returns f32 [B, n_actions * n_quantiles].
    """
    pp = prepared
    wdtype = pp["dtype"]
    F, out_dim = pp["F"], pp["out_dim"]
    F_pad, H_pad, O_pad = pp["F_pad"], pp["H_pad"], pp["O_pad"]
    itemsize = jnp.dtype(wdtype).itemsize

    B = x.shape[0]
    sub = _sublane_multiple(wdtype)
    # Adaptive batch tile: target `batch_tile` rows (256 matches the v6e/v7x
    # MXU) but keep batch-padding waste small for awkward B.
    n_tiles = -(-B // batch_tile)
    tb = _round_up(-(-B // n_tiles), sub)
    B_pad = n_tiles * tb

    # Only x is padded per call; weights were padded once in prepare_params().
    x_p = jnp.zeros((B_pad, F_pad), wdtype).at[:B, :F].set(x.astype(wdtype))

    vmem_usable = _vmem_usable_bytes()
    weight_bytes = (F_pad * H_pad + H_pad * H_pad + H_pad * O_pad
                    + 2 * H_pad + O_pad) * itemsize
    fused_footprint = (weight_bytes                     # single-buffered resident
                       + 2 * tb * F_pad * itemsize
                       + 2 * tb * O_pad * 4
                       + 2 * tb * H_pad * 4)

    if force_tiled or fused_footprint > vmem_usable:
        # Fallback: weights streamed through three K/N-tiled pipelined matmuls.
        h = _tiled_linear(x_p, pp["w1"], pp["b1"], out_dtype=wdtype,
                          activate=True, tb=tb, vmem_usable=vmem_usable)
        h = _tiled_linear(h, pp["w2"], pp["b2"], out_dtype=wdtype,
                          activate=True, tb=tb, vmem_usable=vmem_usable)
        out_p = _tiled_linear(h, pp["w3"], pp["b3"], out_dtype=jnp.float32,
                              activate=False, tb=tb, vmem_usable=vmem_usable)
    else:
        out_p = _fused_forward(x_p, pp, tb=tb, vmem_usable=vmem_usable)

    return out_p[:B, :out_dim]


# ----------------------- init / reference / test ----------------------------


def xavier_uniform(key, shape):
    # shape = (in_dim, out_dim); matches torch.nn.init.xavier_uniform_ on the
    # (out_dim, in_dim) PyTorch weight (fan_in/fan_out are symmetric here).
    fan_in, fan_out = shape[0], shape[1]
    limit = jnp.sqrt(6.0 / (fan_in + fan_out))
    return jax.random.uniform(key, shape, jnp.float32, -limit, limit)


def init_densenet(key, n_features, n_actions, n_quantiles, n_hidden=None,
                  dtype=jnp.float32):
    if n_hidden is None:
        n_hidden = 50 * n_features
    out_dim = n_actions * n_quantiles
    k1, k2, k3 = jax.random.split(key, 3)
    w1 = xavier_uniform(k1, (n_features, n_hidden)).astype(dtype)
    b1 = jnp.zeros((1, n_hidden), dtype)
    w2 = xavier_uniform(k2, (n_hidden, n_hidden)).astype(dtype)
    b2 = jnp.zeros((1, n_hidden), dtype)
    w3 = xavier_uniform(k3, (n_hidden, out_dim)).astype(dtype)
    b3 = jnp.zeros((1, out_dim), dtype)
    return (w1, b1, w2, b2, w3, b3)


def _reference_forward(x, params):
    """Plain-JAX reference mirroring the kernel's dtype/cast behaviour."""
    w1, b1, w2, b2, w3, b3 = params
    wdt = w1.dtype
    xw = x.astype(wdt)
    h = jnp.maximum(
        jnp.dot(xw, w1, preferred_element_type=jnp.float32) + b1.astype(jnp.float32), 0.0)
    h = jnp.maximum(
        jnp.dot(h.astype(wdt), w2, preferred_element_type=jnp.float32)
        + b2.astype(jnp.float32), 0.0)
    return (jnp.dot(h.astype(wdt), w3, preferred_element_type=jnp.float32)
            + b3.astype(jnp.float32))


if __name__ == "__main__":
    key = jax.random.PRNGKey(0)
    n_features, n_actions, n_quantiles = 4, 3, 8   # H = 50*4 = 200, out = 24
    batch = 2

    k_params, k_x = jax.random.split(key)
    x = jax.random.normal(k_x, (batch, n_features), jnp.float32)

    # --- float32, fused resident-weight path ---
    params_f32 = init_densenet(k_params, n_features, n_actions, n_quantiles,
                               dtype=jnp.float32)
    prepared_f32 = prepare_params(params_f32)       # pad weights ONCE
    out = densenet_forward(x, prepared_f32)
    jax.block_until_ready(out)
    ref = _reference_forward(x, params_f32)
    assert out.shape == (batch, n_actions * n_quantiles)
    assert jnp.allclose(out, ref, atol=1e-4, rtol=1e-4), "f32 fused mismatch"

    # --- float32, K/N-tiled fallback path (same numerics) ---
    out_tiled = densenet_forward(x, prepared_f32, force_tiled=True)
    jax.block_until_ready(out_tiled)
    assert jnp.allclose(out_tiled, ref, atol=1e-4, rtol=1e-4), "f32 tiled mismatch"

    # --- bf16 weights/activations (f32 MXU accumulation) ---
    params_bf16 = jax.tree_util.tree_map(lambda p: p.astype(jnp.bfloat16),
                                         params_f32)
    prepared_bf16 = prepare_params(params_bf16)
    out_bf16 = densenet_forward(x, prepared_bf16)
    jax.block_until_ready(out_bf16)
    ref_bf16 = _reference_forward(x, params_bf16)
    assert out_bf16.shape == (batch, n_actions * n_quantiles)
    assert bool(jnp.all(jnp.isfinite(out_bf16)))
    assert jnp.allclose(out_bf16, ref_bf16, atol=5e-2, rtol=5e-2), "bf16 mismatch"

    print("KERNEL_OK")
</pallas_src>

<mosaic_0001>
module attributes {stable_mosaic.version = 11 : i64} {
  func.func @_densenet_kernel(%arg0: i32, %arg1: memref<8x128xf32, #tpu.memory_space<vmem>>, %arg2: memref<128x256xf32, #tpu.memory_space<vmem>>, %arg3: memref<1x256xf32, #tpu.memory_space<vmem>>, %arg4: memref<256x256xf32, #tpu.memory_space<vmem>>, %arg5: memref<1x256xf32, #tpu.memory_space<vmem>>, %arg6: memref<256x128xf32, #tpu.memory_space<vmem>>, %arg7: memref<1x128xf32, #tpu.memory_space<vmem>>, %arg8: memref<8x128xf32, #tpu.memory_space<vmem>>) attributes {dimension_semantics = [#tpu.dimension_semantics<arbitrary>], iteration_bounds = array<i64: 1>, scalar_prefetch = 0 : i64, scratch_operands = 0 : i64, tpu.core_type = #tpu.core_type<tc>, window_params = [{transform_indices = @transform_0, window_bounds = array<i64: 8, 128>}, {pipeline_mode = #tpu.pipeline_mode<synchronous>, transform_indices = @transform_1, window_bounds = array<i64: 128, 256>}, {pipeline_mode = #tpu.pipeline_mode<synchronous>, transform_indices = @transform_2, window_bounds = array<i64: 1, 256>}, {pipeline_mode = #tpu.pipeline_mode<synchronous>, transform_indices = @transform_3, window_bounds = array<i64: 256, 256>}, {pipeline_mode = #tpu.pipeline_mode<synchronous>, transform_indices = @transform_4, window_bounds = array<i64: 1, 256>}, {pipeline_mode = #tpu.pipeline_mode<synchronous>, transform_indices = @transform_5, window_bounds = array<i64: 256, 128>}, {pipeline_mode = #tpu.pipeline_mode<synchronous>, transform_indices = @transform_6, window_bounds = array<i64: 1, 128>}, {transform_indices = @transform_7, window_bounds = array<i64: 8, 128>}]} {
    %c0 = arith.constant 0 : index
    %c0_0 = arith.constant 0 : index
    %0 = vector.load %arg1[%c0, %c0_0] : memref<8x128xf32, #tpu.memory_space<vmem>>, vector<8x128xf32>
    %c0_1 = arith.constant 0 : index
    %c0_2 = arith.constant 0 : index
    %1 = vector.load %arg2[%c0_1, %c0_2] : memref<128x256xf32, #tpu.memory_space<vmem>>, vector<128x256xf32>
    %cst = arith.constant dense<0.000000e+00> : vector<8x256xf32>
    %2 = tpu.matmul %0, %1, %cst {dimension_numbers = #tpu.dot_dimension_numbers<[1], [0], [0], [1], [0, 0, 1, 1], [], []>} : vector<8x128xf32>, vector<128x256xf32>, vector<8x256xf32> -> vector<8x256xf32>
    %c0_3 = arith.constant 0 : index
    %c0_4 = arith.constant 0 : index
    %3 = vector.load %arg3[%c0_3, %c0_4] : memref<1x256xf32, #tpu.memory_space<vmem>>, vector<1x256xf32>
    %4 = vector.broadcast %3 : vector<1x256xf32> to vector<8x256xf32>
    %5 = arith.addf %2, %4 : vector<8x256xf32>
    %cst_5 = arith.constant 0.000000e+00 : f32
    %6 = vector.broadcast %cst_5 : f32 to vector<8x256xf32>
    %7 = arith.maximumf %5, %6 : vector<8x256xf32>
    %c0_6 = arith.constant 0 : index
    %c0_7 = arith.constant 0 : index
    %8 = vector.load %arg4[%c0_6, %c0_7] : memref<256x256xf32, #tpu.memory_space<vmem>>, vector<256x256xf32>
    %cst_8 = arith.constant dense<0.000000e+00> : vector<8x256xf32>
    %9 = tpu.matmul %7, %8, %cst_8 {dimension_numbers = #tpu.dot_dimension_numbers<[1], [0], [0], [1], [0, 0, 1, 1], [], []>} : vector<8x256xf32>, vector<256x256xf32>, vector<8x256xf32> -> vector<8x256xf32>
    %c0_9 = arith.constant 0 : index
    %c0_10 = arith.constant 0 : index
    %10 = vector.load %arg5[%c0_9, %c0_10] : memref<1x256xf32, #tpu.memory_space<vmem>>, vector<1x256xf32>
    %11 = vector.broadcast %10 : vector<1x256xf32> to vector<8x256xf32>
    %12 = arith.addf %9, %11 : vector<8x256xf32>
    %cst_11 = arith.constant 0.000000e+00 : f32
    %13 = vector.broadcast %cst_11 : f32 to vector<8x256xf32>
    %14 = arith.maximumf %12, %13 : vector<8x256xf32>
    %c0_12 = arith.constant 0 : index
    %c0_13 = arith.constant 0 : index
    %15 = vector.load %arg6[%c0_12, %c0_13] : memref<256x128xf32, #tpu.memory_space<vmem>>, vector<256x128xf32>
    %cst_14 = arith.constant dense<0.000000e+00> : vector<8x128xf32>
    %16 = tpu.matmul %14, %15, %cst_14 {dimension_numbers = #tpu.dot_dimension_numbers<[1], [0], [0], [1], [0, 0, 1, 1], [], []>} : vector<8x256xf32>, vector<256x128xf32>, vector<8x128xf32> -> vector<8x128xf32>
    %c0_15 = arith.constant 0 : index
    %c0_16 = arith.constant 0 : index
    %17 = vector.load %arg7[%c0_15, %c0_16] : memref<1x128xf32, #tpu.memory_space<vmem>>, vector<1x128xf32>
    %18 = vector.broadcast %17 : vector<1x128xf32> to vector<8x128xf32>
    %19 = arith.addf %16, %18 : vector<8x128xf32>
    %c0_17 = arith.constant 0 : index
    %c0_18 = arith.constant 0 : index
    %20 = vector.load %arg8[%c0_17, %c0_18] : memref<8x128xf32, #tpu.memory_space<vmem>>, vector<8x128xf32>
    tpu.vector_store %arg8[%c0_17, %c0_18], %19 {strides = array<i32>} : memref<8x128xf32, #tpu.memory_space<vmem>>, vector<8x128xf32>,
    return
  }
  func.func @transform_0(%arg0: i32) -> (i32, i32) {
    %c0_i32 = arith.constant 0 : i32
    %c0_i32_0 = arith.constant 0 : i32
    return %arg0, %c0_i32 : i32, i32
  }
  func.func @transform_1(%arg0: i32) -> (i32, i32) {
    %c0_i32 = arith.constant 0 : i32
    %c0_i32_0 = arith.constant 0 : i32
    %c0_i32_1 = arith.constant 0 : i32
    return %c0_i32, %c0_i32_0 : i32, i32
  }
  func.func @transform_2(%arg0: i32) -> (i32, i32) {
    %c0_i32 = arith.constant 0 : i32
    %c0_i32_0 = arith.constant 0 : i32
    %c0_i32_1 = arith.constant 0 : i32
    return %c0_i32, %c0_i32_0 : i32, i32
  }
  func.func @transform_3(%arg0: i32) -> (i32, i32) {
    %c0_i32 = arith.constant 0 : i32
    %c0_i32_0 = arith.constant 0 : i32
    %c0_i32_1 = arith.constant 0 : i32
    return %c0_i32, %c0_i32_0 : i32, i32
  }
  func.func @transform_4(%arg0: i32) -> (i32, i32) {
    %c0_i32 = arith.constant 0 : i32
    %c0_i32_0 = arith.constant 0 : i32
    %c0_i32_1 = arith.constant 0 : i32
    return %c0_i32, %c0_i32_0 : i32, i32
  }
  func.func @transform_5(%arg0: i32) -> (i32, i32) {
    %c0_i32 = arith.constant 0 : i32
    %c0_i32_0 = arith.constant 0 : i32
    %c0_i32_1 = arith.constant 0 : i32
    return %c0_i32, %c0_i32_0 : i32, i32
  }
  func.func @transform_6(%arg0: i32) -> (i32, i32) {
    %c0_i32 = arith.constant 0 : i32
    %c0_i32_0 = arith.constant 0 : i32
    %c0_i32_1 = arith.constant 0 : i32
    return %c0_i32, %c0_i32_0 : i32, i32
  }
  func.func @transform_7(%arg0: i32) -> (i32, i32) {
    %c0_i32 = arith.constant 0 : i32
    %c0_i32_0 = arith.constant 0 : i32
    return %arg0, %c0_i32 : i32, i32
  }
}

module attributes {stable_mosaic.version = 11 : i64} {
  func.func @_densenet_kernel(%arg0: i32, %arg1: memref<8x128xf32, #tpu.memory_space<vmem>>, %arg2: memref<128x256xf32, #tpu.memory_space<vmem>>, %arg3: memref<1x256xf32, #tpu.memory_space<vmem>>, %arg4: memref<256x256xf32, #tpu.memory_space<vmem>>, %arg5: memref<1x256xf32, #tpu.memory_space<vmem>>, %arg6: memref<256x128xf32, #tpu.memory_space<vmem>>, %arg7: memref<1x128xf32, #tpu.memory_space<vmem>>, %arg8: memref<8x128xf32, #tpu.memory_space<vmem>>) attributes {dimension_semantics = [#tpu.dimension_semantics<arbitrary>], iteration_bounds = array<i64: 1>, scalar_prefetch = 0 : i64, scratch_operands = 0 : i64, tpu.core_type = #tpu.core_type<tc>, window_params = [{transform_indices = @transform_0, window_bounds = array<i64: 8, 128>}, {pipeline_mode = #tpu.pipeline_mode<synchronous>, transform_indices = @transform_1, window_bounds = array<i64: 128, 256>}, {pipeline_mode = #tpu.pipeline_mode<synchronous>, transform_indices = @transform_2, window_bounds = array<i64: 1, 256>}, {pipeline_mode = #tpu.pipeline_mode<synchronous>, transform_indices = @transform_3, window_bounds = array<i64: 256, 256>}, {pipeline_mode = #tpu.pipeline_mode<synchronous>, transform_indices = @transform_4, window_bounds = array<i64: 1, 256>}, {pipeline_mode = #tpu.pipeline_mode<synchronous>, transform_indices = @transform_5, window_bounds = array<i64: 256, 128>}, {pipeline_mode = #tpu.pipeline_mode<synchronous>, transform_indices = @transform_6, window_bounds = array<i64: 1, 128>}, {transform_indices = @transform_7, window_bounds = array<i64: 8, 128>}]} {
    %c0 = arith.constant 0 : index
    %c0_0 = arith.constant 0 : index
    %0 = vector.load %arg1[%c0, %c0_0] : memref<8x128xf32, #tpu.memory_space<vmem>>, vector<8x128xf32>
    %c0_1 = arith.constant 0 : index
    %c0_2 = arith.constant 0 : index
    %1 = vector.load %arg2[%c0_1, %c0_2] : memref<128x256xf32, #tpu.memory_space<vmem>>, vector<128x256xf32>
    %cst = arith.constant dense<0.000000e+00> : vector<8x256xf32>
    %2 = tpu.matmul %0, %1, %cst {dimension_numbers = #tpu.dot_dimension_numbers<[1], [0], [0], [1], [0, 0, 1, 1], [], []>} : vector<8x128xf32>, vector<128x256xf32>, vector<8x256xf32> -> vector<8x256xf32>
    %c0_3 = arith.constant 0 : index
    %c0_4 = arith.constant 0 : index
    %3 = vector.load %arg3[%c0_3, %c0_4] : memref<1x256xf32, #tpu.memory_space<vmem>>, vector<1x256xf32>
    %4 = vector.broadcast %3 : vector<1x256xf32> to vector<8x256xf32>
    %5 = arith.addf %2, %4 : vector<8x256xf32>
    %cst_5 = arith.constant 0.000000e+00 : f32
    %6 = vector.broadcast %cst_5 : f32 to vector<8x256xf32>
    %7 = arith.maximumf %5, %6 : vector<8x256xf32>
    %c0_6 = arith.constant 0 : index
    %c0_7 = arith.constant 0 : index
    %8 = vector.load %arg4[%c0_6, %c0_7] : memref<256x256xf32, #tpu.memory_space<vmem>>, vector<256x256xf32>
    %cst_8 = arith.constant dense<0.000000e+00> : vector<8x256xf32>
    %9 = tpu.matmul %7, %8, %cst_8 {dimension_numbers = #tpu.dot_dimension_numbers<[1], [0], [0], [1], [0, 0, 1, 1], [], []>} : vector<8x256xf32>, vector<256x256xf32>, vector<8x256xf32> -> vector<8x256xf32>
    %c0_9 = arith.constant 0 : index
    %c0_10 = arith.constant 0 : index
    %10 = vector.load %arg5[%c0_9, %c0_10] : memref<1x256xf32, #tpu.memory_space<vmem>>, vector<1x256xf32>
    %11 = vector.broadcast %10 : vector<1x256xf32> to vector<8x256xf32>
    %12 = arith.addf %9, %11 : vector<8x256xf32>
    %cst_11 = arith.constant 0.000000e+00 : f32
    %13 = vector.broadcast %cst_11 : f32 to vector<8x256xf32>
    %14 = arith.maximumf %12, %13 : vector<8x256xf32>
    %c0_12 = arith.constant 0 : index
    %c0_13 = arith.constant 0 : index
    %15 = vector.load %arg6[%c0_12, %c0_13] : memref<256x128xf32, #tpu.memory_space<vmem>>, vector<256x128xf32>
    %cst_14 = arith.constant dense<0.000000e+00> : vector<8x128xf32>
    %16 = tpu.matmul %14, %15, %cst_14 {dimension_numbers = #tpu.dot_dimension_numbers<[1], [0], [0], [1], [0, 0, 1, 1], [], []>} : vector<8x256xf32>, vector<256x128xf32>, vector<8x128xf32> -> vector<8x128xf32>
    %c0_15 = arith.constant 0 : index
    %c0_16 = arith.constant 0 : index
    %17 = vector.load %arg7[%c0_15, %c0_16] : memref<1x128xf32, #tpu.memory_space<vmem>>, vector<1x128xf32>
    %18 = vector.broadcast %17 : vector<1x128xf32> to vector<8x128xf32>
    %19 = arith.addf %16, %18 : vector<8x128xf32>
    %c0_17 = arith.constant 0 : index
    %c0_18 = arith.constant 0 : index
    %20 = vector.load %arg8[%c0_17, %c0_18] : memref<8x128xf32, #tpu.memory_space<vmem>>, vector<8x128xf32>
    tpu.vector_store %arg8[%c0_17, %c0_18], %19 {strides = array<i32>} : memref<8x128xf32, #tpu.memory_space<vmem>>, vector<8x128xf32>,
    return
  }
  func.func @transform_0(%arg0: i32) -> (i32, i32) {
    %c0_i32 = arith.constant 0 : i32
    %c0_i32_0 = arith.constant 0 : i32
    return %arg0, %c0_i32 : i32, i32
  }
  func.func @transform_1(%arg0: i32) -> (i32, i32) {
    %c0_i32 = arith.constant 0 : i32
    %c0_i32_0 = arith.constant 0 : i32
    %c0_i32_1 = arith.constant 0 : i32
    return %c0_i32, %c0_i32_0 : i32, i32
  }
  func.func @transform_2(%arg0: i32) -> (i32, i32) {
    %c0_i32 = arith.constant 0 : i32
    %c0_i32_0 = arith.constant 0 : i32
    %c0_i32_1 = arith.constant 0 : i32
    return %c0_i32, %c0_i32_0 : i32, i32
  }
  func.func @transform_3(%arg0: i32) -> (i32, i32) {
    %c0_i32 = arith.constant 0 : i32
    %c0_i32_0 = arith.constant 0 : i32
    %c0_i32_1 = arith.constant 0 : i32
    return %c0_i32, %c0_i32_0 : i32, i32
  }
  func.func @transform_4(%arg0: i32) -> (i32, i32) {
    %c0_i32 = arith.constant 0 : i32
    %c0_i32_0 = arith.constant 0 : i32
    %c0_i32_1 = arith.constant 0 : i32
    return %c0_i32, %c0_i32_0 : i32, i32
  }
  func.func @transform_5(%arg0: i32) -> (i32, i32) {
    %c0_i32 = arith.constant 0 : i32
    %c0_i32_0 = arith.constant 0 : i32
    %c0_i32_1 = arith.constant 0 : i32
    return %c0_i32, %c0_i32_0 : i32, i32
  }
  func.func @transform_6(%arg0: i32) -> (i32, i32) {
    %c0_i32 = arith.constant 0 : i32
    %c0_i32_0 = arith.constant 0 : i32
    %c0_i32_1 = arith.constant 0 : i32
    return %c0_i32, %c0_i32_0 : i32, i32
  }
  func.func @transform_7(%arg0: i32) -> (i32, i32) {
    %c0_i32 = arith.constant 0 : i32
    %c0_i32_0 = arith.constant 0 : i32
    return %arg0, %c0_i32 : i32, i32
  }
}

</mosaic_0001>

<bundles_post_ra>
// kernel: tpu_custom_call.1
= control target key start
LH: loop header
LB: loop body
LE: loop exit
PB: predicated region body
PF: predicated region fallthrough
CT: control target
= control target key end

     0   :  { %12 = vsyncpa [#allocation3], 0  ;;  %s667_s0 = inlined_call_operand.hbm [shape: f32[8,128], index: 0, kind: input, shape index: {}]   ;;  %s668_s1 = inlined_call_operand.hbm [shape: f32[128,256], index: 1, kind: input, shape index: {}]   ;;  %s669_s2 = inlined_call_operand.hbm [shape: f32[1,256], index: 2, kind: input, shape index: {}]   ;;  %s670_s3 = inlined_call_operand.hbm [shape: f32[256,256], index: 3, kind: input, shape index: {}]   ;;  %s671_s4 = inlined_call_operand.vmem [shape: f32[1,256], index: 4, kind: input, shape index: {}]   ;;  %s672_s5 = inlined_call_operand.hbm [shape: f32[256,128], index: 5, kind: input, shape index: {}]   ;;  %s673_s6 = inlined_call_operand.vmem [shape: f32[1,128], index: 6, kind: input, shape index: {}]   ;;  %s674_s7 = inlined_call_operand.hbm [shape: f32[8,128], index: 7, kind: output, shape index: {}]  }
   0x1   :  { %13 = vsyncpa [#allocation6], 0 }
   0x2   :  { %14 = vsyncpa [#allocation9], 0  ;;  %s31_s26 = sshll.u32 %s668_s1, 4  ;;  %s32_s26 = int_to_ptr.hbm [resolvable:$true] %s31_s26 }
   0x3   :  { %15 = vsyncpa [#allocation4], 0  ;;  %s593_s27 = smov [#allocation5]   ;;  %s55_s8 = sshll.u32 %s670_s3, 4  ;;  %s56_s8 = int_to_ptr.hbm [resolvable:$true] %s55_s8 }
   0x4   :  { %s33_s28 = sshll.u32 %s593_s27, 4  ;;  %s594_s9 = smov 256   ;;  %s34_s28 = int_to_ptr.vmem [resolvable:$true] %s33_s28 }
   0x5   :  { %s595_s10 = smov 16   ;;  %s596_s11 = smov [#allocation8]  }
   0x6   :  { %39 = dma.hbm_to_vmem [thread:$0]  %s32_s26, 4096, %s34_s28, [#allocation6], %s594_s9, %s594_s9, %s595_s10  }
   0x7   :  { %s57_s12 = sshll.u32 %s596_s11, 4  ;;  %s21_s15 = sshll.u32 %s667_s0, 4  ;;  %s58_s12 = int_to_ptr.vmem [resolvable:$true] %s57_s12  ;;  %s22_s15 = int_to_ptr.hbm [resolvable:$true] %s21_s15 }
   0x8   :  { %63 = dma.hbm_to_vmem [thread:$0]  %s56_s8, 8192, %s58_s12, [#allocation9], %s594_s9, %s594_s9, %s595_s10  }
   0x9   :  { %s45_s17 = sshll.u32 %s669_s2, 4  ;;  %s597_s18 = smov [#allocation2]   ;;  %s46_s17 = int_to_ptr.hbm [resolvable:$true] %s45_s17 }
   0xa   :  { %s23_s19 = sshll.u32 %s597_s18, 4  ;;  %s598_s3 = smov [#allocation7]   ;;  %s24_s19 = int_to_ptr.vmem [resolvable:$true] %s23_s19 }
   0xb   :  { %26 = dma.hbm_to_vmem [thread:$0]  %s22_s15, 128, %s24_s19, [#allocation3]  }
   0xc   :  { %s47_s20 = sshll.u32 %s598_s3, 4  ;;  %s70_s23 = sshll.u32 %s672_s5, 4  ;;  %s48_s20 = int_to_ptr.vmem [resolvable:$true] %s47_s20  ;;  %s71_s23 = int_to_ptr.hbm [resolvable:$true] %s70_s23 }
   0xd   :  { %50 = dma.hbm_to_vmem [thread:$0]  %s46_s17, 32, %s48_s20, [#allocation6]  }
   0xe   :  { %s599_s0 = smov [#allocation10]   ;;  %s600_s25 = smov 128  }
   0xf   :  { %s72_s24 = sshll.u32 %s599_s0, 4  ;;  %s601_s26 = smov 8   ;;  %s73_s24 = int_to_ptr.vmem [resolvable:$true] %s72_s24 }
  0x10   :  { %78 = dma.hbm_to_vmem [thread:$0]  %s71_s23, 4096, %s73_s24, [#allocation9], %s600_s25, %s600_s25, %s601_s26  }
  0x11   :  { %585 = dma.done.wait [#allocation3], 128  }
  0x12   :  { %586 = vsyncadd [#allocation3], 4294967168 }
  0x13   :  { %587 = dma.done.wait [#allocation6], 4128  }
  0x14   :  { %588 = vsyncadd [#allocation6], 4294963168 }
  0x15   :  { %589 = dma.done.wait [#allocation9], 12288  }
  0x16   :  { %590 = vsyncadd [#allocation9], 4294955008  ;;  %v132_v0 = vld [vmem:[#allocation5 + $0xf0] sm:$0xff]  ;;  %v130_v1 = vld [vmem:[#allocation5 + $0xe0] sm:$0xff]  ;;  %s418_s9 = sshll.u32 %s674_s7, 4  ;;  %s419_s9 = int_to_ptr.hbm [resolvable:$true] %s418_s9 }
  0x17   :  { %v133_v2 = vld [vmem:[#allocation5 + $0xf8] sm:$0xff]  ;;  %140 = vmatpush.msra.mxu0 %v132_v0  ;;  %v131_v3 = vld [vmem:[#allocation5 + $0xe8] sm:$0xff]  ;;  %v128_v4 = vld [vmem:[#allocation5 + $0xd0] sm:$0xff] }
  0x18   :  { %160 = vmatpush.msra.mxu1 %v133_v2  ;;  %v129_v5 = vld [vmem:[#allocation5 + $0xd8] sm:$0xff]  ;;  %v126_v6 = vld [vmem:[#allocation5 + $0xc0] sm:$0xff]  ;;  %v127_v7 = vld [vmem:[#allocation5 + $0xc8] sm:$0xff] }
  0x19   :  { %141 = vmatpush.msra.mxu0 %v130_v1  ;;  %v124_v8 = vld [vmem:[#allocation5 + $0xb0] sm:$0xff]  ;;  %v125_v9 = vld [vmem:[#allocation5 + $0xb8] sm:$0xff]  ;;  %v122_v10 = vld [vmem:[#allocation5 + $0xa0] sm:$0xff] }
  0x1a   :  { %161 = vmatpush.msra.mxu1 %v131_v3  ;;  %v123_v11 = vld [vmem:[#allocation5 + $0xa8] sm:$0xff]  ;;  %v120_v12 = vld [vmem:[#allocation5 + $0x90] sm:$0xff]  ;;  %v121_v13 = vld [vmem:[#allocation5 + $0x98] sm:$0xff] }
  0x1b   :  { %142 = vmatpush.msra.mxu0 %v128_v4  ;;  %v212_v14 = vld [vmem:[#allocation8 + $0xf0] sm:$0xff]  ;;  %v210_v15 = vld [vmem:[#allocation8 + $0xe0] sm:$0xff]  ;;  %v213_v52 = vld [vmem:[#allocation8 + $0xf8] sm:$0xff] }
  0x1c   :  { %162 = vmatpush.msra.mxu1 %v129_v5  ;;  %v118_v16 = vld [vmem:[#allocation5 + $0x80] sm:$0xff]  ;;  %v119_v17 = vld [vmem:[#allocation5 + $0x88] sm:$0xff]  ;;  %252 = vmatpush.msra.mxu2 %v212_v14  ;;  %v244_v18 = vld [vmem:[#allocation8 + $0x1f0] sm:$0xff] }
  0x1d   :  { %143 = vmatpush.msra.mxu0 %v126_v6  ;;  %v208_v19 = vld [vmem:[#allocation8 + $0xd0] sm:$0xff]  ;;  %v242_v20 = vld [vmem:[#allocation8 + $0x1e0] sm:$0xff]  ;;  %272 = vmatpush.msra.mxu3 %v244_v18  ;;  %v245_v53 = vld [vmem:[#allocation8 + $0x1f8] sm:$0xff] }
  0x1e   :  { %163 = vmatpush.msra.mxu1 %v127_v7  ;;  %v116_v21 = vld [vmem:[#allocation5 + $0x70] sm:$0xff]  ;;  %v117_v22 = vld [vmem:[#allocation5 + $0x78] sm:$0xff]  ;;  %253 = vmatpush.msra.mxu2 %v210_v15  ;;  %v206_v23 = vld [vmem:[#allocation8 + $0xc0] sm:$0xff] }
  0x1f   :  { %144 = vmatpush.msra.mxu0 %v124_v8  ;;  %v240_v24 = vld [vmem:[#allocation8 + $0x1d0] sm:$0xff]  ;;  %v114_v25 = vld [vmem:[#allocation5 + $0x60] sm:$0xff]  ;;  %v115_v26 = vld [vmem:[#allocation5 + $0x68] sm:$0xff]  ;;  %273 = vmatpush.msra.mxu3 %v242_v20 }
  0x20   :  { %164 = vmatpush.msra.mxu1 %v125_v9  ;;  %254 = vmatpush.msra.mxu2 %v208_v19  ;;  %v204_v27 = vld [vmem:[#allocation8 + $0xb0] sm:$0xff]  ;;  %v238_v28 = vld [vmem:[#allocation8 + $0x1c0] sm:$0xff]  ;;  %v211_v56 = vld [vmem:[#allocation8 + $0xe8] sm:$0xff] }
  0x21   :  { %145 = vmatpush.msra.mxu0 %v122_v10  ;;  %v112_v29 = vld [vmem:[#allocation5 + $0x50] sm:$0xff]  ;;  %v113_v30 = vld [vmem:[#allocation5 + $0x58] sm:$0xff]  ;;  %274 = vmatpush.msra.mxu3 %v240_v24  ;;  %v202_v31 = vld [vmem:[#allocation8 + $0xa0] sm:$0xff] }
  0x22   :  { %165 = vmatpush.msra.mxu1 %v123_v11  ;;  %255 = vmatpush.msra.mxu2 %v206_v23  ;;  %v236_v32 = vld [vmem:[#allocation8 + $0x1b0] sm:$0xff]  ;;  %v110_v33 = vld [vmem:[#allocation5 + $0x40] sm:$0xff]  ;;  %v111_v34 = vld [vmem:[#allocation5 + $0x48] sm:$0xff] }
  0x23   :  { %146 = vmatpush.msra.mxu0 %v120_v12  ;;  %275 = vmatpush.msra.mxu3 %v238_v28  ;;  %v200_v35 = vld [vmem:[#allocation8 + $0x90] sm:$0xff]  ;;  %v234_v36 = vld [vmem:[#allocation8 + $0x1a0] sm:$0xff]  ;;  %v243_v57 = vld [vmem:[#allocation8 + $0x1e8] sm:$0xff] }
  0x24   :  { %166 = vmatpush.msra.mxu1 %v121_v13  ;;  %256 = vmatpush.msra.mxu2 %v204_v27  ;;  %v108_v37 = vld [vmem:[#allocation5 + $0x30] sm:$0xff]  ;;  %v109_v38 = vld [vmem:[#allocation5 + $0x38] sm:$0xff]  ;;  %v198_v39 = vld [vmem:[#allocation8 + $0x80] sm:$0xff] }
  0x25   :  { %147 = vmatpush.msra.mxu0 %v118_v16  ;;  %276 = vmatpush.msra.mxu3 %v236_v32  ;;  %v232_v40 = vld [vmem:[#allocation8 + $0x190] sm:$0xff]  ;;  %v106_v41 = vld [vmem:[#allocation5 + $0x20] sm:$0xff]  ;;  %v107_v42 = vld [vmem:[#allocation5 + $0x28] sm:$0xff] }
  0x26   :  { %167 = vmatpush.msra.mxu1 %v119_v17  ;;  %257 = vmatpush.msra.mxu2 %v202_v31  ;;  %v196_v43 = vld [vmem:[#allocation8 + $0x70] sm:$0xff]  ;;  %v230_v44 = vld [vmem:[#allocation8 + $0x180] sm:$0xff]  ;;  %v209_v60 = vld [vmem:[#allocation8 + $0xd8] sm:$0xff] }
  0x27   :  { %148 = vmatpush.msra.mxu0 %v116_v21  ;;  %277 = vmatpush.msra.mxu3 %v234_v36  ;;  %v104_v45 = vld [vmem:[#allocation5 + $0x10] sm:$0xff]  ;;  %v105_v46 = vld [vmem:[#allocation5 + $0x18] sm:$0xff]  ;;  %v194_v47 = vld [vmem:[#allocation8 + $0x60] sm:$0xff] }
  0x28   :  { %168 = vmatpush.msra.mxu1 %v117_v22  ;;  %258 = vmatpush.msra.mxu2 %v200_v35  ;;  %v228_v48 = vld [vmem:[#allocation8 + $0x170] sm:$0xff]  ;;  %v102_v49 = vld [vmem:[#allocation5] sm:$0xff]  ;;  %v103_v50 = vld [vmem:[#allocation5 + $0x8] sm:$0xff] }
  0x29   :  { %149 = vmatpush.msra.mxu0 %v114_v25  ;;  %278 = vmatpush.msra.mxu3 %v232_v40  ;;  %v101_v51 = vld [vmem:[#allocation2] sm:$0xff]  ;;  %v226_v55 = vld [vmem:[#allocation8 + $0x160] sm:$0xff]  ;;  %v207_v0 = vld [vmem:[#allocation8 + $0xc8] sm:$0xff] }
  0x2a   :  { %169 = vmatpush.msra.mxu1 %v115_v26  ;;  %259 = vmatpush.msra.mxu2 %v198_v39  ;;  %v192_v54 = vld [vmem:[#allocation8 + $0x50] sm:$0xff]  ;;  %v190_v58 = vld [vmem:[#allocation8 + $0x40] sm:$0xff]  ;;  %v241_v61 = vld [vmem:[#allocation8 + $0x1d8] sm:$0xff] }
  0x2b   :  { %150 = vmatpush.msra.mxu0 %v112_v29  ;;  %279 = vmatpush.msra.mxu3 %v230_v44  ;;  %v224_v59 = vld [vmem:[#allocation8 + $0x150] sm:$0xff]  ;;  %v222_v63 = vld [vmem:[#allocation8 + $0x140] sm:$0xff]  ;;  %v239_v1 = vld [vmem:[#allocation8 + $0x1c8] sm:$0xff] }
  0x2c   :  { %170 = vmatpush.msra.mxu1 %v113_v30  ;;  %260 = vmatpush.msra.mxu2 %v196_v43  ;;  %v188_v62 = vld [vmem:[#allocation8 + $0x30] sm:$0xff]  ;;  %v205_v2 = vld [vmem:[#allocation8 + $0xb8] sm:$0xff]  ;;  %v203_v4 = vld [vmem:[#allocation8 + $0xa8] sm:$0xff] }
  0x2d   :  { %151 = vmatpush.msra.mxu0 %v110_v33  ;;  %280 = vmatpush.msra.mxu3 %v228_v48  ;;  %v237_v3 = vld [vmem:[#allocation8 + $0x1b8] sm:$0xff]  ;;  %v235_v5 = vld [vmem:[#allocation8 + $0x1a8] sm:$0xff]  ;;  %v186_v19 = vld [vmem:[#allocation8 + $0x20] sm:$0xff] }
  0x2e   :  { %171 = vmatpush.msra.mxu1 %v111_v34  ;;  %261 = vmatpush.msra.mxu2 %v194_v47  ;;  %v201_v6 = vld [vmem:[#allocation8 + $0x98] sm:$0xff]  ;;  %v199_v8 = vld [vmem:[#allocation8 + $0x88] sm:$0xff]  ;;  %v220_v20 = vld [vmem:[#allocation8 + $0x130] sm:$0xff] }
  0x2f   :  { %152 = vmatpush.msra.mxu0 %v108_v37  ;;  %281 = vmatpush.msra.mxu3 %v226_v55  ;;  %v233_v7 = vld [vmem:[#allocation8 + $0x198] sm:$0xff]  ;;  %v231_v9 = vld [vmem:[#allocation8 + $0x188] sm:$0xff]  ;;  %v184_v23 = vld [vmem:[#allocation8 + $0x10] sm:$0xff] }
  0x30   :  { %172 = vmatpush.msra.mxu1 %v109_v38  ;;  %262 = vmatpush.msra.mxu2 %v192_v54  ;;  %v197_v10 = vld [vmem:[#allocation8 + $0x78] sm:$0xff]  ;;  %v195_v12 = vld [vmem:[#allocation8 + $0x68] sm:$0xff]  ;;  %v218_v24 = vld [vmem:[#allocation8 + $0x120] sm:$0xff] }
  0x31   :  { %153 = vmatpush.msra.mxu0 %v106_v41  ;;  %282 = vmatpush.msra.mxu3 %v224_v59  ;;  %v229_v11 = vld [vmem:[#allocation8 + $0x178] sm:$0xff]  ;;  %v227_v13 = vld [vmem:[#allocation8 + $0x168] sm:$0xff]  ;;  %v182_v27 = vld [vmem:[#allocation8] sm:$0xff] }
  0x32   :  { %173 = vmatpush.msra.mxu1 %v107_v42  ;;  %263 = vmatpush.msra.mxu2 %v190_v58  ;;  %v193_v14 = vld [vmem:[#allocation8 + $0x58] sm:$0xff]  ;;  %v191_v16 = vld [vmem:[#allocation8 + $0x48] sm:$0xff]  ;;  %v216_v28 = vld [vmem:[#allocation8 + $0x110] sm:$0xff] }
  0x33   :  { %154 = vmatpush.msra.mxu0 %v104_v45  ;;  %283 = vmatpush.msra.mxu3 %v222_v63  ;;  %v225_v15 = vld [vmem:[#allocation8 + $0x158] sm:$0xff]  ;;  %v223_v17 = vld [vmem:[#allocation8 + $0x148] sm:$0xff]  ;;  %v214_v31 = vld [vmem:[#allocation8 + $0x100] sm:$0xff] }
  0x34   :  { %174 = vmatpush.msra.mxu1 %v105_v46  ;;  %264 = vmatpush.msra.mxu2 %v188_v62  ;;  %v189_v18 = vld [vmem:[#allocation8 + $0x38] sm:$0xff]  ;;  %v187_v21 = vld [vmem:[#allocation8 + $0x28] sm:$0xff]  ;;  %v364_v34 = vld [vmem:[#allocation10 + $0xf0] sm:$0xff] }
  0x35   :  { %155 = vmatpush.msra.mxu0 %v102_v49  ;;  %284 = vmatpush.msra.mxu3 %v220_v20  ;;  %v221_v22 = vld [vmem:[#allocation8 + $0x138] sm:$0xff]  ;;  %v219_v26 = vld [vmem:[#allocation8 + $0x128] sm:$0xff]  ;;  %v348_v36 = vld [vmem:[#allocation10 + $0x70] sm:$0xff] }
  0x36   :  { %175 = vmatpush.msra.mxu1 %v103_v50  ;;  %156 = vmatmul.f32.vlgmr.msra.gmra.mxu0 %v101_v51  ;;  %v185_v25 = vld [vmem:[#allocation8 + $0x18] sm:$0xff]  ;;  %v183_v29 = vld [vmem:[#allocation8 + $0x8] sm:$0xff]  ;;  %v362_v39 = vld [vmem:[#allocation10 + $0xe0] sm:$0xff] }
  0x37   :  { %176 = vmatmul.f32.vlgmr.msra.gmra.mxu1 %v101_v51  ;;  %292 = vmatpush.msrb.mxu0 %v213_v52  ;;  %v217_v30 = vld [vmem:[#allocation8 + $0x118] sm:$0xff]  ;;  %v215_v32 = vld [vmem:[#allocation8 + $0x108] sm:$0xff]  ;;  %v346_v40 = vld [vmem:[#allocation10 + $0x60] sm:$0xff] }
  0x38   :  { %312 = vmatpush.msrb.mxu1 %v245_v53  ;;  %265 = vmatpush.msra.mxu2 %v186_v19  ;;  %v365_v33 = vld [vmem:[#allocation10 + $0xf8] sm:$0xff]  ;;  %v363_v37 = vld [vmem:[#allocation10 + $0xe8] sm:$0xff]  ;;  %v360_v43 = vld [vmem:[#allocation10 + $0xd0] sm:$0xff] }
  0x39   :  { %293 = vmatpush.msrb.mxu0 %v211_v56  ;;  %285 = vmatpush.msra.mxu3 %v218_v24  ;;  %v349_v35 = vld [vmem:[#allocation10 + $0x78] sm:$0xff]  ;;  %v347_v38 = vld [vmem:[#allocation10 + $0x68] sm:$0xff]  ;;  %v344_v44 = vld [vmem:[#allocation10 + $0x50] sm:$0xff] }
  0x3a   :  { %313 = vmatpush.msrb.mxu1 %v243_v57  ;;  %266 = vmatpush.msra.mxu2 %v184_v23  ;;  %v361_v41 = vld [vmem:[#allocation10 + $0xd8] sm:$0xff]  ;;  %v359_v45 = vld [vmem:[#allocation10 + $0xc8] sm:$0xff]  ;;  %v358_v47 = vld [vmem:[#allocation10 + $0xc0] sm:$0xff] }
  0x3b   :  { %294 = vmatpush.msrb.mxu0 %v209_v60  ;;  %286 = vmatpush.msra.mxu3 %v216_v28  ;;  %v345_v42 = vld [vmem:[#allocation10 + $0x58] sm:$0xff]  ;;  %v343_v46 = vld [vmem:[#allocation10 + $0x48] sm:$0xff]  ;;  %v342_v48 = vld [vmem:[#allocation10 + $0x40] sm:$0xff] }
  0x3c   :  { %314 = vmatpush.msrb.mxu1 %v241_v61  ;;  %267 = vmatpush.msra.mxu2 %v182_v27  ;;  %v357_v49 = vld [vmem:[#allocation10 + $0xb8] sm:$0xff]  ;;  %v356_v51 = vld [vmem:[#allocation10 + $0xb0] sm:$0xff]  ;;  %v355_v52 = vld [vmem:[#allocation10 + $0xa8] sm:$0xff] }
  0x3d   :  { %295 = vmatpush.msrb.mxu0 %v207_v0  ;;  %287 = vmatpush.msra.mxu3 %v214_v31  ;;  %v341_v50 = vld [vmem:[#allocation10 + $0x38] sm:$0xff]  ;;  %v354_v54 = vld [vmem:[#allocation10 + $0xa0] sm:$0xff]  ;;  %v340_v63 = vld [vmem:[#allocation10 + $0x30] sm:$0xff] }
  0x3e   :  { %315 = vmatpush.msrb.mxu1 %v239_v1  ;;  %370 = vmatpush.msrb.mxu2 %v349_v35  ;;  %v134_v53 = vld [vmem:[#allocation7] sm:$0x3]  ;;  %v339_v1 = vld [vmem:[#allocation10 + $0x28] sm:$0xff]  ;;  %v440_v23 = vld [vmem:[%s673_s6] ss:$0 sm:$0xff] }
  0x3f   :  { %296 = vmatpush.msrb.mxu0 %v205_v2  ;;  %390 = vmatpush.msrb.mxu3 %v365_v33  ;;  %v136_v55 = vperm.slane %v134_v53, 0  ;;  %v137_v56 = vperm.slane %v134_v53, 1  ;;  %v353_v0 = vld [vmem:[#allocation10 + $0x98] sm:$0xff]  ;;  %v352_v2 = vld [vmem:[#allocation10 + $0x90] sm:$0xff] }
  0x40   :  { %316 = vmatpush.msrb.mxu1 %v237_v3  ;;  %371 = vmatpush.msrb.mxu2 %v348_v36  ;;  %v338_v3 = vld [vmem:[#allocation10 + $0x20] sm:$0xff] }
  0x41   :  { %297 = vmatpush.msrb.mxu0 %v203_v4  ;;  %391 = vmatpush.msrb.mxu3 %v364_v34  ;;  %v351_v4 = vld [vmem:[#allocation10 + $0x88] sm:$0xff] }
  0x42   :  { %317 = vmatpush.msrb.mxu1 %v235_v5  ;;  %372 = vmatpush.msrb.mxu2 %v347_v38  ;;  %v337_v5 = vld [vmem:[#allocation10 + $0x18] sm:$0xff] }
  0x43   :  { %298 = vmatpush.msrb.mxu0 %v201_v6  ;;  %392 = vmatpush.msrb.mxu3 %v363_v37  ;;  %v350_v6 = vld [vmem:[#allocation10 + $0x80] sm:$0xff] }
  0x44   :  { %318 = vmatpush.msrb.mxu1 %v233_v7  ;;  %373 = vmatpush.msrb.mxu2 %v346_v40  ;;  %v336_v7 = vld [vmem:[#allocation10 + $0x10] sm:$0xff] }
  0x45   :  { %299 = vmatpush.msrb.mxu0 %v199_v8  ;;  %393 = vmatpush.msrb.mxu3 %v362_v39  ;;  %v335_v8 = vld [vmem:[#allocation10 + $0x8] sm:$0xff] }
  0x46   :  { %319 = vmatpush.msrb.mxu1 %v231_v9  ;;  %374 = vmatpush.msrb.mxu2 %v345_v42  ;;  %v334_v9 = vld [vmem:[#allocation10] sm:$0xff] }
  0x47   :  { %300 = vmatpush.msrb.mxu0 %v197_v10  ;;  %394 = vmatpush.msrb.mxu3 %v361_v41  ;;  %v246_v10 = vld [vmem:[%s671_s4] sm:$0x3]  ;;  %s602_s4 = smov [#allocation11]  }
  0x48   :  { %320 = vmatpush.msrb.mxu1 %v229_v11  ;;  %375 = vmatpush.msrb.mxu2 %v344_v44  ;;  %v249_v11 = vperm.slane %v246_v10, 1  ;;  %s416_s29 = sshll.u32 %s602_s4, 4  ;;  %s417_s29 = int_to_ptr.vmem [resolvable:$true] %s416_s29 }
  0x49   :  { %301 = vmatpush.msrb.mxu0 %v195_v12  ;;  %395 = vmatpush.msrb.mxu3 %v360_v43 }
  0x4a   :  { %321 = vmatpush.msrb.mxu1 %v227_v13  ;;  %376 = vmatpush.msrb.mxu2 %v343_v46 }
  0x4b   :  { %302 = vmatpush.msrb.mxu0 %v193_v14  ;;  %396 = vmatpush.msrb.mxu3 %v359_v45 }
  0x4c   :  { %322 = vmatpush.msrb.mxu1 %v225_v15  ;;  %377 = vmatpush.msrb.mxu2 %v342_v48 }
  0x4d   :  { %303 = vmatpush.msrb.mxu0 %v191_v16  ;;  %397 = vmatpush.msrb.mxu3 %v358_v47  ;;  %v248_v16 = vperm.slane %v246_v10, 0 }
  0x4e   :  { %323 = vmatpush.msrb.mxu1 %v223_v17  ;;  %378 = vmatpush.msrb.mxu2 %v341_v50 }
  0x4f   :  { %304 = vmatpush.msrb.mxu0 %v189_v18  ;;  %398 = vmatpush.msrb.mxu3 %v357_v49 }
  0x50   :  { %324 = vmatpush.msrb.mxu1 %v221_v22  ;;  %379 = vmatpush.msrb.mxu2 %v340_v63 }
  0x51   :  { %305 = vmatpush.msrb.mxu0 %v187_v21  ;;  %399 = vmatpush.msrb.mxu3 %v356_v51 }
  0x52   :  { %325 = vmatpush.msrb.mxu1 %v219_v26  ;;  %380 = vmatpush.msrb.mxu2 %v339_v1 }
  0x53   :  { %306 = vmatpush.msrb.mxu0 %v185_v25  ;;  %400 = vmatpush.msrb.mxu3 %v355_v52 }
  0x54   :  { %326 = vmatpush.msrb.mxu1 %v217_v30  ;;  %381 = vmatpush.msrb.mxu2 %v338_v3 }
  0x55   :  { %307 = vmatpush.msrb.mxu0 %v183_v29  ;;  %401 = vmatpush.msrb.mxu3 %v354_v54 }
  0x56   :  { %327 = vmatpush.msrb.mxu1 %v215_v32  ;;  %382 = vmatpush.msrb.mxu2 %v337_v5 }
  0x57   :  { %402 = vmatpush.msrb.mxu3 %v353_v0 }
  0x58   :  { %383 = vmatpush.msrb.mxu2 %v336_v7 }
  0x59   :  { %403 = vmatpush.msrb.mxu3 %v352_v2 }
  0x5a   :  { %384 = vmatpush.msrb.mxu2 %v335_v8 }
  0x5b   :  { %404 = vmatpush.msrb.mxu3 %v351_v4 }
  0x5c   :  { %385 = vmatpush.msrb.mxu2 %v334_v9 }
  0x5d   :  { %405 = vmatpush.msrb.mxu3 %v350_v6 }
  0xb3   :  { %v157_v57 = vpop.f32.mrf.mxu0 }
  0xb4   :  { %v177_v58 = vpop.f32.mrf.mxu1  ;;  %v158_v59 = vadd.f32 %v157_v57, %v136_v55 }
  0xb5   :  { %v178_v60 = vadd.f32 %v177_v58, %v137_v56 }
  0xb6   :  { %v180_v61 = vmax.f32 %v158_v59, 0.0 }
  0xb7   :  { %v181_v62 = vmax.f32 %v178_v60, 0.0 }
  0xb8   :  { %268 = vmatmul.f32.vlgmr.msra.gmra.mxu2 %v180_v61  ;;  %308 = vmatmul.f32.vlgmr.msrb.gmra.mxu0 %v180_v61 }
  0xb9   :  { %288 = vmatmul.f32.vlgmr.msra.gmra.mxu3 %v181_v62  ;;  %328 = vmatmul.f32.vlgmr.msrb.gmra.mxu1 %v181_v62 }
 0x135   :  { %v309_v12 = vpop.f32.mrf.mxu0 }
 0x136   :  { %v310_v13 = vadd.f32 %v309_v12, %v249_v11  ;;  %v329_v14 = vpop.f32.mrf.mxu1 }
 0x138   :  { %v330_v15 = vadd.f32 %v329_v14, %v310_v13 }
 0x13a   :  { %v333_v17 = vmax.f32 %v330_v15, 0.0 }
 0x13b   :  { %v269_v18 = vpop.f32.mrf.mxu2 }
 0x13c   :  { %v270_v19 = vadd.f32 %v269_v18, %v248_v16  ;;  %406 = vmatmul.f32.vlgmr.msrb.gmra.mxu3 %v333_v17  ;;  %v289_v20 = vpop.f32.mrf.mxu3 }
 0x13e   :  { %v290_v21 = vadd.f32 %v289_v20, %v270_v19 }
 0x140   :  { %v332_v22 = vmax.f32 %v290_v21, 0.0 }
 0x142   :  { %386 = vmatmul.f32.vlgmr.msrb.gmra.mxu2 %v332_v22 }
 0x1bf   :  { %v407_v26 = vpop.f32.mrf.mxu3 }
 0x1c5   :  { %v387_v24 = vpop.f32.mrf.mxu2 }
 0x1c6   :  { %v388_v25 = vadd.f32 %v440_v23, %v387_v24 }
 0x1c8   :  { %v408_v27 = vadd.f32 %v407_v26, %v388_v25 }
 0x1ca   :  { %410 = vst [vmem:[#allocation11] sm:$0xff] %v408_v27 }
 0x1cb   :  { %421 = dma.vmem_to_hbm [thread:$0]  %s417_s29, 128, %s419_s9, [#allocation4]  }
 0x1cc   :  { %591 = dma.done.wait [#allocation4], 128  }
 0x1cd   :  { %592 = vsyncadd [#allocation4], 4294967168 }
 0x1ce   :  { %426 = vsyncpa [#allocation3], 1 }
 0x1cf   :  { %427 = vsyncpa [#allocation6], 1 }
 0x1d0   :  { %428 = vsyncpa [#allocation9], 1 }
 0x1d1   :  { %429 = vsyncpa [#allocation4], 1 }

// kernel: tpu_custom_call.1
= control target key start
LH: loop header
LB: loop body
LE: loop exit
PB: predicated region body
PF: predicated region fallthrough
CT: control target
= control target key end

     0   :  { %12 = vsyncpa [#allocation3], 0  ;;  %s667_s0 = inlined_call_operand.hbm [shape: f32[8,128], index: 0, kind: input, shape index: {}]   ;;  %s668_s1 = inlined_call_operand.hbm [shape: f32[128,256], index: 1, kind: input, shape index: {}]   ;;  %s669_s2 = inlined_call_operand.hbm [shape: f32[1,256], index: 2, kind: input, shape index: {}]   ;;  %s670_s3 = inlined_call_operand.hbm [shape: f32[256,256], index: 3, kind: input, shape index: {}]   ;;  %s671_s4 = inlined_call_operand.vmem [shape: f32[1,256], index: 4, kind: input, shape index: {}]   ;;  %s672_s5 = inlined_call_operand.hbm [shape: f32[256,128], index: 5, kind: input, shape index: {}]   ;;  %s673_s6 = inlined_call_operand.vmem [shape: f32[1,128], index: 6, kind: input, shape index: {}]   ;;  %s674_s7 = inlined_call_operand.hbm [shape: f32[8,128], index: 7, kind: output, shape index: {}]  }
   0x1   :  { %13 = vsyncpa [#allocation6], 0 }
   0x2   :  { %14 = vsyncpa [#allocation9], 0  ;;  %s31_s26 = sshll.u32 %s668_s1, 4  ;;  %s32_s26 = int_to_ptr.hbm [resolvable:$true] %s31_s26 }
   0x3   :  { %15 = vsyncpa [#allocation4], 0  ;;  %s593_s27 = smov [#allocation5]   ;;  %s55_s8 = sshll.u32 %s670_s3, 4  ;;  %s56_s8 = int_to_ptr.hbm [resolvable:$true] %s55_s8 }
   0x4   :  { %s33_s28 = sshll.u32 %s593_s27, 4  ;;  %s594_s9 = smov 256   ;;  %s34_s28 = int_to_ptr.vmem [resolvable:$true] %s33_s28 }
   0x5   :  { %s595_s10 = smov 16   ;;  %s596_s11 = smov [#allocation8]  }
   0x6   :  { %39 = dma.hbm_to_vmem [thread:$0]  %s32_s26, 4096, %s34_s28, [#allocation6], %s594_s9, %s594_s9, %s595_s10  }
   0x7   :  { %s57_s12 = sshll.u32 %s596_s11, 4  ;;  %s21_s15 = sshll.u32 %s667_s0, 4  ;;  %s58_s12 = int_to_ptr.vmem [resolvable:$true] %s57_s12  ;;  %s22_s15 = int_to_ptr.hbm [resolvable:$true] %s21_s15 }
   0x8   :  { %63 = dma.hbm_to_vmem [thread:$0]  %s56_s8, 8192, %s58_s12, [#allocation9], %s594_s9, %s594_s9, %s595_s10  }
   0x9   :  { %s45_s17 = sshll.u32 %s669_s2, 4  ;;  %s597_s18 = smov [#allocation2]   ;;  %s46_s17 = int_to_ptr.hbm [resolvable:$true] %s45_s17 }
   0xa   :  { %s23_s19 = sshll.u32 %s597_s18, 4  ;;  %s598_s3 = smov [#allocation7]   ;;  %s24_s19 = int_to_ptr.vmem [resolvable:$true] %s23_s19 }
   0xb   :  { %26 = dma.hbm_to_vmem [thread:$0]  %s22_s15, 128, %s24_s19, [#allocation3]  }
   0xc   :  { %s47_s20 = sshll.u32 %s598_s3, 4  ;;  %s70_s23 = sshll.u32 %s672_s5, 4  ;;  %s48_s20 = int_to_ptr.vmem [resolvable:$true] %s47_s20  ;;  %s71_s23 = int_to_ptr.hbm [resolvable:$true] %s70_s23 }
   0xd   :  { %50 = dma.hbm_to_vmem [thread:$0]  %s46_s17, 32, %s48_s20, [#allocation6]  }
   0xe   :  { %s599_s0 = smov [#allocation10]   ;;  %s600_s25 = smov 128  }
   0xf   :  { %s72_s24 = sshll.u32 %s599_s0, 4  ;;  %s601_s26 = smov 8   ;;  %s73_s24 = int_to_ptr.vmem [resolvable:$true] %s72_s24 }
  0x10   :  { %78 = dma.hbm_to_vmem [thread:$0]  %s71_s23, 4096, %s73_s24, [#allocation9], %s600_s25, %s600_s25, %s601_s26  }
  0x11   :  { %585 = dma.done.wait [#allocation3], 128  }
  0x12   :  { %586 = vsyncadd [#allocation3], 4294967168 }
  0x13   :  { %587 = dma.done.wait [#allocation6], 4128  }
  0x14   :  { %588 = vsyncadd [#allocation6], 4294963168 }
  0x15   :  { %589 = dma.done.wait [#allocation9], 12288  }
  0x16   :  { %590 = vsyncadd [#allocation9], 4294955008  ;;  %v132_v0 = vld [vmem:[#allocation5 + $0xf0] sm:$0xff]  ;;  %v130_v1 = vld [vmem:[#allocation5 + $0xe0] sm:$0xff]  ;;  %s418_s9 = sshll.u32 %s674_s7, 4  ;;  %s419_s9 = int_to_ptr.hbm [resolvable:$true] %s418_s9 }
  0x17   :  { %v133_v2 = vld [vmem:[#allocation5 + $0xf8] sm:$0xff]  ;;  %140 = vmatpush.msra.mxu0 %v132_v0  ;;  %v131_v3 = vld [vmem:[#allocation5 + $0xe8] sm:$0xff]  ;;  %v128_v4 = vld [vmem:[#allocation5 + $0xd0] sm:$0xff] }
  0x18   :  { %160 = vmatpush.msra.mxu1 %v133_v2  ;;  %v129_v5 = vld [vmem:[#allocation5 + $0xd8] sm:$0xff]  ;;  %v126_v6 = vld [vmem:[#allocation5 + $0xc0] sm:$0xff]  ;;  %v127_v7 = vld [vmem:[#allocation5 + $0xc8] sm:$0xff] }
  0x19   :  { %141 = vmatpush.msra.mxu0 %v130_v1  ;;  %v124_v8 = vld [vmem:[#allocation5 + $0xb0] sm:$0xff]  ;;  %v125_v9 = vld [vmem:[#allocation5 + $0xb8] sm:$0xff]  ;;  %v122_v10 = vld [vmem:[#allocation5 + $0xa0] sm:$0xff] }
  0x1a   :  { %161 = vmatpush.msra.mxu1 %v131_v3  ;;  %v123_v11 = vld [vmem:[#allocation5 + $0xa8] sm:$0xff]  ;;  %v120_v12 = vld [vmem:[#allocation5 + $0x90] sm:$0xff]  ;;  %v121_v13 = vld [vmem:[#allocation5 + $0x98] sm:$0xff] }
  0x1b   :  { %142 = vmatpush.msra.mxu0 %v128_v4  ;;  %v212_v14 = vld [vmem:[#allocation8 + $0xf0] sm:$0xff]  ;;  %v210_v15 = vld [vmem:[#allocation8 + $0xe0] sm:$0xff]  ;;  %v213_v52 = vld [vmem:[#allocation8 + $0xf8] sm:$0xff] }
  0x1c   :  { %162 = vmatpush.msra.mxu1 %v129_v5  ;;  %v118_v16 = vld [vmem:[#allocation5 + $0x80] sm:$0xff]  ;;  %v119_v17 = vld [vmem:[#allocation5 + $0x88] sm:$0xff]  ;;  %252 = vmatpush.msra.mxu2 %v212_v14  ;;  %v244_v18 = vld [vmem:[#allocation8 + $0x1f0] sm:$0xff] }
  0x1d   :  { %143 = vmatpush.msra.mxu0 %v126_v6  ;;  %v208_v19 = vld [vmem:[#allocation8 + $0xd0] sm:$0xff]  ;;  %v242_v20 = vld [vmem:[#allocation8 + $0x1e0] sm:$0xff]  ;;  %272 = vmatpush.msra.mxu3 %v244_v18  ;;  %v245_v53 = vld [vmem:[#allocation8 + $0x1f8] sm:$0xff] }
  0x1e   :  { %163 = vmatpush.msra.mxu1 %v127_v7  ;;  %v116_v21 = vld [vmem:[#allocation5 + $0x70] sm:$0xff]  ;;  %v117_v22 = vld [vmem:[#allocation5 + $0x78] sm:$0xff]  ;;  %253 = vmatpush.msra.mxu2 %v210_v15  ;;  %v206_v23 = vld [vmem:[#allocation8 + $0xc0] sm:$0xff] }
  0x1f   :  { %144 = vmatpush.msra.mxu0 %v124_v8  ;;  %v240_v24 = vld [vmem:[#allocation8 + $0x1d0] sm:$0xff]  ;;  %v114_v25 = vld [vmem:[#allocation5 + $0x60] sm:$0xff]  ;;  %v115_v26 = vld [vmem:[#allocation5 + $0x68] sm:$0xff]  ;;  %273 = vmatpush.msra.mxu3 %v242_v20 }
  0x20   :  { %164 = vmatpush.msra.mxu1 %v125_v9  ;;  %254 = vmatpush.msra.mxu2 %v208_v19  ;;  %v204_v27 = vld [vmem:[#allocation8 + $0xb0] sm:$0xff]  ;;  %v238_v28 = vld [vmem:[#allocation8 + $0x1c0] sm:$0xff]  ;;  %v211_v56 = vld [vmem:[#allocation8 + $0xe8] sm:$0xff] }
  0x21   :  { %145 = vmatpush.msra.mxu0 %v122_v10  ;;  %v112_v29 = vld [vmem:[#allocation5 + $0x50] sm:$0xff]  ;;  %v113_v30 = vld [vmem:[#allocation5 + $0x58] sm:$0xff]  ;;  %274 = vmatpush.msra.mxu3 %v240_v24  ;;  %v202_v31 = vld [vmem:[#allocation8 + $0xa0] sm:$0xff] }
  0x22   :  { %165 = vmatpush.msra.mxu1 %v123_v11  ;;  %255 = vmatpush.msra.mxu2 %v206_v23  ;;  %v236_v32 = vld [vmem:[#allocation8 + $0x1b0] sm:$0xff]  ;;  %v110_v33 = vld [vmem:[#allocation5 + $0x40] sm:$0xff]  ;;  %v111_v34 = vld [vmem:[#allocation5 + $0x48] sm:$0xff] }
  0x23   :  { %146 = vmatpush.msra.mxu0 %v120_v12  ;;  %275 = vmatpush.msra.mxu3 %v238_v28  ;;  %v200_v35 = vld [vmem:[#allocation8 + $0x90] sm:$0xff]  ;;  %v234_v36 = vld [vmem:[#allocation8 + $0x1a0] sm:$0xff]  ;;  %v243_v57 = vld [vmem:[#allocation8 + $0x1e8] sm:$0xff] }
  0x24   :  { %166 = vmatpush.msra.mxu1 %v121_v13  ;;  %256 = vmatpush.msra.mxu2 %v204_v27  ;;  %v108_v37 = vld [vmem:[#allocation5 + $0x30] sm:$0xff]  ;;  %v109_v38 = vld [vmem:[#allocation5 + $0x38] sm:$0xff]  ;;  %v198_v39 = vld [vmem:[#allocation8 + $0x80] sm:$0xff] }
  0x25   :  { %147 = vmatpush.msra.mxu0 %v118_v16  ;;  %276 = vmatpush.msra.mxu3 %v236_v32  ;;  %v232_v40 = vld [vmem:[#allocation8 + $0x190] sm:$0xff]  ;;  %v106_v41 = vld [vmem:[#allocation5 + $0x20] sm:$0xff]  ;;  %v107_v42 = vld [vmem:[#allocation5 + $0x28] sm:$0xff] }
  0x26   :  { %167 = vmatpush.msra.mxu1 %v119_v17  ;;  %257 = vmatpush.msra.mxu2 %v202_v31  ;;  %v196_v43 = vld [vmem:[#allocation8 + $0x70] sm:$0xff]  ;;  %v230_v44 = vld [vmem:[#allocation8 + $0x180] sm:$0xff]  ;;  %v209_v60 = vld [vmem:[#allocation8 + $0xd8] sm:$0xff] }
  0x27   :  { %148 = vmatpush.msra.mxu0 %v116_v21  ;;  %277 = vmatpush.msra.mxu3 %v234_v36  ;;  %v104_v45 = vld [vmem:[#allocation5 + $0x10] sm:$0xff]  ;;  %v105_v46 = vld [vmem:[#allocation5 + $0x18] sm:$0xff]  ;;  %v194_v47 = vld [vmem:[#allocation8 + $0x60] sm:$0xff] }
  0x28   :  { %168 = vmatpush.msra.mxu1 %v117_v22  ;;  %258 = vmatpush.msra.mxu2 %v200_v35  ;;  %v228_v48 = vld [vmem:[#allocation8 + $0x170] sm:$0xff]  ;;  %v102_v49 = vld [vmem:[#allocation5] sm:$0xff]  ;;  %v103_v50 = vld [vmem:[#allocation5 + $0x8] sm:$0xff] }
  0x29   :  { %149 = vmatpush.msra.mxu0 %v114_v25  ;;  %278 = vmatpush.msra.mxu3 %v232_v40  ;;  %v101_v51 = vld [vmem:[#allocation2] sm:$0xff]  ;;  %v226_v55 = vld [vmem:[#allocation8 + $0x160] sm:$0xff]  ;;  %v207_v0 = vld [vmem:[#allocation8 + $0xc8] sm:$0xff] }
  0x2a   :  { %169 = vmatpush.msra.mxu1 %v115_v26  ;;  %259 = vmatpush.msra.mxu2 %v198_v39  ;;  %v192_v54 = vld [vmem:[#allocation8 + $0x50] sm:$0xff]  ;;  %v190_v58 = vld [vmem:[#allocation8 + $0x40] sm:$0xff]  ;;  %v241_v61 = vld [vmem:[#allocation8 + $0x1d8] sm:$0xff] }
  0x2b   :  { %150 = vmatpush.msra.mxu0 %v112_v29  ;;  %279 = vmatpush.msra.mxu3 %v230_v44  ;;  %v224_v59 = vld [vmem:[#allocation8 + $0x150] sm:$0xff]  ;;  %v222_v63 = vld [vmem:[#allocation8 + $0x140] sm:$0xff]  ;;  %v239_v1 = vld [vmem:[#allocation8 + $0x1c8] sm:$0xff] }
  0x2c   :  { %170 = vmatpush.msra.mxu1 %v113_v30  ;;  %260 = vmatpush.msra.mxu2 %v196_v43  ;;  %v188_v62 = vld [vmem:[#allocation8 + $0x30] sm:$0xff]  ;;  %v205_v2 = vld [vmem:[#allocation8 + $0xb8] sm:$0xff]  ;;  %v203_v4 = vld [vmem:[#allocation8 + $0xa8] sm:$0xff] }
  0x2d   :  { %151 = vmatpush.msra.mxu0 %v110_v33  ;;  %280 = vmatpush.msra.mxu3 %v228_v48  ;;  %v237_v3 = vld [vmem:[#allocation8 + $0x1b8] sm:$0xff]  ;;  %v235_v5 = vld [vmem:[#allocation8 + $0x1a8] sm:$0xff]  ;;  %v186_v19 = vld [vmem:[#allocation8 + $0x20] sm:$0xff] }
  0x2e   :  { %171 = vmatpush.msra.mxu1 %v111_v34  ;;  %261 = vmatpush.msra.mxu2 %v194_v47  ;;  %v201_v6 = vld [vmem:[#allocation8 + $0x98] sm:$0xff]  ;;  %v199_v8 = vld [vmem:[#allocation8 + $0x88] sm:$0xff]  ;;  %v220_v20 = vld [vmem:[#allocation8 + $0x130] sm:$0xff] }
  0x2f   :  { %152 = vmatpush.msra.mxu0 %v108_v37  ;;  %281 = vmatpush.msra.mxu3 %v226_v55  ;;  %v233_v7 = vld [vmem:[#allocation8 + $0x198] sm:$0xff]  ;;  %v231_v9 = vld [vmem:[#allocation8 + $0x188] sm:$0xff]  ;;  %v184_v23 = vld [vmem:[#allocation8 + $0x10] sm:$0xff] }
  0x30   :  { %172 = vmatpush.msra.mxu1 %v109_v38  ;;  %262 = vmatpush.msra.mxu2 %v192_v54  ;;  %v197_v10 = vld [vmem:[#allocation8 + $0x78] sm:$0xff]  ;;  %v195_v12 = vld [vmem:[#allocation8 + $0x68] sm:$0xff]  ;;  %v218_v24 = vld [vmem:[#allocation8 + $0x120] sm:$0xff] }
  0x31   :  { %153 = vmatpush.msra.mxu0 %v106_v41  ;;  %282 = vmatpush.msra.mxu3 %v224_v59  ;;  %v229_v11 = vld [vmem:[#allocation8 + $0x178] sm:$0xff]  ;;  %v227_v13 = vld [vmem:[#allocation8 + $0x168] sm:$0xff]  ;;  %v182_v27 = vld [vmem:[#allocation8] sm:$0xff] }
  0x32   :  { %173 = vmatpush.msra.mxu1 %v107_v42  ;;  %263 = vmatpush.msra.mxu2 %v190_v58  ;;  %v193_v14 = vld [vmem:[#allocation8 + $0x58] sm:$0xff]  ;;  %v191_v16 = vld [vmem:[#allocation8 + $0x48] sm:$0xff]  ;;  %v216_v28 = vld [vmem:[#allocation8 + $0x110] sm:$0xff] }
  0x33   :  { %154 = vmatpush.msra.mxu0 %v104_v45  ;;  %283 = vmatpush.msra.mxu3 %v222_v63  ;;  %v225_v15 = vld [vmem:[#allocation8 + $0x158] sm:$0xff]  ;;  %v223_v17 = vld [vmem:[#allocation8 + $0x148] sm:$0xff]  ;;  %v214_v31 = vld [vmem:[#allocation8 + $0x100] sm:$0xff] }
  0x34   :  { %174 = vmatpush.msra.mxu1 %v105_v46  ;;  %264 = vmatpush.msra.mxu2 %v188_v62  ;;  %v189_v18 = vld [vmem:[#allocation8 + $0x38] sm:$0xff]  ;;  %v187_v21 = vld [vmem:[#allocation8 + $0x28] sm:$0xff]  ;;  %v364_v34 = vld [vmem:[#allocation10 + $0xf0] sm:$0xff] }
  0x35   :  { %155 = vmatpush.msra.mxu0 %v102_v49  ;;  %284 = vmatpush.msra.mxu3 %v220_v20  ;;  %v221_v22 = vld [vmem:[#allocation8 + $0x138] sm:$0xff]  ;;  %v219_v26 = vld [vmem:[#allocation8 + $0x128] sm:$0xff]  ;;  %v348_v36 = vld [vmem:[#allocation10 + $0x70] sm:$0xff] }
  0x36   :  { %175 = vmatpush.msra.mxu1 %v103_v50  ;;  %156 = vmatmul.f32.vlgmr.msra.gmra.mxu0 %v101_v51  ;;  %v185_v25 = vld [vmem:[#allocation8 + $0x18] sm:$0xff]  ;;  %v183_v29 = vld [vmem:[#allocation8 + $0x8] sm:$0xff]  ;;  %v362_v39 = vld [vmem:[#allocation10 + $0xe0] sm:$0xff] }
  0x37   :  { %176 = vmatmul.f32.vlgmr.msra.gmra.mxu1 %v101_v51  ;;  %292 = vmatpush.msrb.mxu0 %v213_v52  ;;  %v217_v30 = vld [vmem:[#allocation8 + $0x118] sm:$0xff]  ;;  %v215_v32 = vld [vmem:[#allocation8 + $0x108] sm:$0xff]  ;;  %v346_v40 = vld [vmem:[#allocation10 + $0x60] sm:$0xff] }
  0x38   :  { %312 = vmatpush.msrb.mxu1 %v245_v53  ;;  %265 = vmatpush.msra.mxu2 %v186_v19  ;;  %v365_v33 = vld [vmem:[#allocation10 + $0xf8] sm:$0xff]  ;;  %v363_v37 = vld [vmem:[#allocation10 + $0xe8] sm:$0xff]  ;;  %v360_v43 = vld [vmem:[#allocation10 + $0xd0] sm:$0xff] }
  0x39   :  { %293 = vmatpush.msrb.mxu0 %v211_v56  ;;  %285 = vmatpush.msra.mxu3 %v218_v24  ;;  %v349_v35 = vld [vmem:[#allocation10 + $0x78] sm:$0xff]  ;;  %v347_v38 = vld [vmem:[#allocation10 + $0x68] sm:$0xff]  ;;  %v344_v44 = vld [vmem:[#allocation10 + $0x50] sm:$0xff] }
  0x3a   :  { %313 = vmatpush.msrb.mxu1 %v243_v57  ;;  %266 = vmatpush.msra.mxu2 %v184_v23  ;;  %v361_v41 = vld [vmem:[#allocation10 + $0xd8] sm:$0xff]  ;;  %v359_v45 = vld [vmem:[#allocation10 + $0xc8] sm:$0xff]  ;;  %v358_v47 = vld [vmem:[#allocation10 + $0xc0] sm:$0xff] }
  0x3b   :  { %294 = vmatpush.msrb.mxu0 %v209_v60  ;;  %286 = vmatpush.msra.mxu3 %v216_v28  ;;  %v345_v42 = vld [vmem:[#allocation10 + $0x58] sm:$0xff]  ;;  %v343_v46 = vld [vmem:[#allocation10 + $0x48] sm:$0xff]  ;;  %v342_v48 = vld [vmem:[#allocation10 + $0x40] sm:$0xff] }
  0x3c   :  { %314 = vmatpush.msrb.mxu1 %v241_v61  ;;  %267 = vmatpush.msra.mxu2 %v182_v27  ;;  %v357_v49 = vld [vmem:[#allocation10 + $0xb8] sm:$0xff]  ;;  %v356_v51 = vld [vmem:[#allocation10 + $0xb0] sm:$0xff]  ;;  %v355_v52 = vld [vmem:[#allocation10 + $0xa8] sm:$0xff] }
  0x3d   :  { %295 = vmatpush.msrb.mxu0 %v207_v0  ;;  %287 = vmatpush.msra.mxu3 %v214_v31  ;;  %v341_v50 = vld [vmem:[#allocation10 + $0x38] sm:$0xff]  ;;  %v354_v54 = vld [vmem:[#allocation10 + $0xa0] sm:$0xff]  ;;  %v340_v63 = vld [vmem:[#allocation10 + $0x30] sm:$0xff] }
  0x3e   :  { %315 = vmatpush.msrb.mxu1 %v239_v1  ;;  %370 = vmatpush.msrb.mxu2 %v349_v35  ;;  %v134_v53 = vld [vmem:[#allocation7] sm:$0x3]  ;;  %v339_v1 = vld [vmem:[#allocation10 + $0x28] sm:$0xff]  ;;  %v440_v23 = vld [vmem:[%s673_s6] ss:$0 sm:$0xff] }
  0x3f   :  { %296 = vmatpush.msrb.mxu0 %v205_v2  ;;  %390 = vmatpush.msrb.mxu3 %v365_v33  ;;  %v136_v55 = vperm.slane %v134_v53, 0  ;;  %v137_v56 = vperm.slane %v134_v53, 1  ;;  %v353_v0 = vld [vmem:[#allocation10 + $0x98] sm:$0xff]  ;;  %v352_v2 = vld [vmem:[#allocation10 + $0x90] sm:$0xff] }
  0x40   :  { %316 = vmatpush.msrb.mxu1 %v237_v3  ;;  %371 = vmatpush.msrb.mxu2 %v348_v36  ;;  %v338_v3 = vld [vmem:[#allocation10 + $0x20] sm:$0xff] }
  0x41   :  { %297 = vmatpush.msrb.mxu0 %v203_v4  ;;  %391 = vmatpush.msrb.mxu3 %v364_v34  ;;  %v351_v4 = vld [vmem:[#allocation10 + $0x88] sm:$0xff] }
  0x42   :  { %317 = vmatpush.msrb.mxu1 %v235_v5  ;;  %372 = vmatpush.msrb.mxu2 %v347_v38  ;;  %v337_v5 = vld [vmem:[#allocation10 + $0x18] sm:$0xff] }
  0x43   :  { %298 = vmatpush.msrb.mxu0 %v201_v6  ;;  %392 = vmatpush.msrb.mxu3 %v363_v37  ;;  %v350_v6 = vld [vmem:[#allocation10 + $0x80] sm:$0xff] }
  0x44   :  { %318 = vmatpush.msrb.mxu1 %v233_v7  ;;  %373 = vmatpush.msrb.mxu2 %v346_v40  ;;  %v336_v7 = vld [vmem:[#allocation10 + $0x10] sm:$0xff] }
  0x45   :  { %299 = vmatpush.msrb.mxu0 %v199_v8  ;;  %393 = vmatpush.msrb.mxu3 %v362_v39  ;;  %v335_v8 = vld [vmem:[#allocation10 + $0x8] sm:$0xff] }
  0x46   :  { %319 = vmatpush.msrb.mxu1 %v231_v9  ;;  %374 = vmatpush.msrb.mxu2 %v345_v42  ;;  %v334_v9 = vld [vmem:[#allocation10] sm:$0xff] }
  0x47   :  { %300 = vmatpush.msrb.mxu0 %v197_v10  ;;  %394 = vmatpush.msrb.mxu3 %v361_v41  ;;  %v246_v10 = vld [vmem:[%s671_s4] sm:$0x3]  ;;  %s602_s4 = smov [#allocation11]  }
  0x48   :  { %320 = vmatpush.msrb.mxu1 %v229_v11  ;;  %375 = vmatpush.msrb.mxu2 %v344_v44  ;;  %v249_v11 = vperm.slane %v246_v10, 1  ;;  %s416_s29 = sshll.u32 %s602_s4, 4  ;;  %s417_s29 = int_to_ptr.vmem [resolvable:$true] %s416_s29 }
  0x49   :  { %301 = vmatpush.msrb.mxu0 %v195_v12  ;;  %395 = vmatpush.msrb.mxu3 %v360_v43 }
  0x4a   :  { %321 = vmatpush.msrb.mxu1 %v227_v13  ;;  %376 = vmatpush.msrb.mxu2 %v343_v46 }
  0x4b   :  { %302 = vmatpush.msrb.mxu0 %v193_v14  ;;  %396 = vmatpush.msrb.mxu3 %v359_v45 }
  0x4c   :  { %322 = vmatpush.msrb.mxu1 %v225_v15  ;;  %377 = vmatpush.msrb.mxu2 %v342_v48 }
  0x4d   :  { %303 = vmatpush.msrb.mxu0 %v191_v16  ;;  %397 = vmatpush.msrb.mxu3 %v358_v47  ;;  %v248_v16 = vperm.slane %v246_v10, 0 }
  0x4e   :  { %323 = vmatpush.msrb.mxu1 %v223_v17  ;;  %378 = vmatpush.msrb.mxu2 %v341_v50 }
  0x4f   :  { %304 = vmatpush.msrb.mxu0 %v189_v18  ;;  %398 = vmatpush.msrb.mxu3 %v357_v49 }
  0x50   :  { %324 = vmatpush.msrb.mxu1 %v221_v22  ;;  %379 = vmatpush.msrb.mxu2 %v340_v63 }
  0x51   :  { %305 = vmatpush.msrb.mxu0 %v187_v21  ;;  %399 = vmatpush.msrb.mxu3 %v356_v51 }
  0x52   :  { %325 = vmatpush.msrb.mxu1 %v219_v26  ;;  %380 = vmatpush.msrb.mxu2 %v339_v1 }
  0x53   :  { %306 = vmatpush.msrb.mxu0 %v185_v25  ;;  %400 = vmatpush.msrb.mxu3 %v355_v52 }
  0x54   :  { %326 = vmatpush.msrb.mxu1 %v217_v30  ;;  %381 = vmatpush.msrb.mxu2 %v338_v3 }
  0x55   :  { %307 = vmatpush.msrb.mxu0 %v183_v29  ;;  %401 = vmatpush.msrb.mxu3 %v354_v54 }
  0x56   :  { %327 = vmatpush.msrb.mxu1 %v215_v32  ;;  %382 = vmatpush.msrb.mxu2 %v337_v5 }
  0x57   :  { %402 = vmatpush.msrb.mxu3 %v353_v0 }
  0x58   :  { %383 = vmatpush.msrb.mxu2 %v336_v7 }
  0x59   :  { %403 = vmatpush.msrb.mxu3 %v352_v2 }
  0x5a   :  { %384 = vmatpush.msrb.mxu2 %v335_v8 }
  0x5b   :  { %404 = vmatpush.msrb.mxu3 %v351_v4 }
  0x5c   :  { %385 = vmatpush.msrb.mxu2 %v334_v9 }
  0x5d   :  { %405 = vmatpush.msrb.mxu3 %v350_v6 }
  0xb3   :  { %v157_v57 = vpop.f32.mrf.mxu0 }
  0xb4   :  { %v177_v58 = vpop.f32.mrf.mxu1  ;;  %v158_v59 = vadd.f32 %v157_v57, %v136_v55 }
  0xb5   :  { %v178_v60 = vadd.f32 %v177_v58, %v137_v56 }
  0xb6   :  { %v180_v61 = vmax.f32 %v158_v59, 0.0 }
  0xb7   :  { %v181_v62 = vmax.f32 %v178_v60, 0.0 }
  0xb8   :  { %268 = vmatmul.f32.vlgmr.msra.gmra.mxu2 %v180_v61  ;;  %308 = vmatmul.f32.vlgmr.msrb.gmra.mxu0 %v180_v61 }
  0xb9   :  { %288 = vmatmul.f32.vlgmr.msra.gmra.mxu3 %v181_v62  ;;  %328 = vmatmul.f32.vlgmr.msrb.gmra.mxu1 %v181_v62 }
 0x135   :  { %v309_v12 = vpop.f32.mrf.mxu0 }
 0x136   :  { %v310_v13 = vadd.f32 %v309_v12, %v249_v11  ;;  %v329_v14 = vpop.f32.mrf.mxu1 }
 0x138   :  { %v330_v15 = vadd.f32 %v329_v14, %v310_v13 }
 0x13a   :  { %v333_v17 = vmax.f32 %v330_v15, 0.0 }
 0x13b   :  { %v269_v18 = vpop.f32.mrf.mxu2 }
 0x13c   :  { %v270_v19 = vadd.f32 %v269_v18, %v248_v16  ;;  %406 = vmatmul.f32.vlgmr.msrb.gmra.mxu3 %v333_v17  ;;  %v289_v20 = vpop.f32.mrf.mxu3 }
 0x13e   :  { %v290_v21 = vadd.f32 %v289_v20, %v270_v19 }
 0x140   :  { %v332_v22 = vmax.f32 %v290_v21, 0.0 }
 0x142   :  { %386 = vmatmul.f32.vlgmr.msrb.gmra.mxu2 %v332_v22 }
 0x1bf   :  { %v407_v26 = vpop.f32.mrf.mxu3 }
 0x1c5   :  { %v387_v24 = vpop.f32.mrf.mxu2 }
 0x1c6   :  { %v388_v25 = vadd.f32 %v440_v23, %v387_v24 }
 0x1c8   :  { %v408_v27 = vadd.f32 %v407_v26, %v388_v25 }
 0x1ca   :  { %410 = vst [vmem:[#allocation11] sm:$0xff] %v408_v27 }
 0x1cb   :  { %421 = dma.vmem_to_hbm [thread:$0]  %s417_s29, 128, %s419_s9, [#allocation4]  }
 0x1cc   :  { %591 = dma.done.wait [#allocation4], 128  }
 0x1cd   :  { %592 = vsyncadd [#allocation4], 4294967168 }
 0x1ce   :  { %426 = vsyncpa [#allocation3], 1 }
 0x1cf   :  { %427 = vsyncpa [#allocation6], 1 }
 0x1d0   :  { %428 = vsyncpa [#allocation9], 1 }
 0x1d1   :  { %429 = vsyncpa [#allocation4], 1 }

</bundles_post_ra>
